<compile_context>
chip_gen: v7x
topology: tpu7x:2x2x1
jax: 0.10.0
libtpu: 0.0.40
codegen_flags: <defaults>
</compile_context>

<pallas_src>
import functools

import jax
import jax.numpy as jnp
from jax.experimental import pallas as pl
from jax.experimental.pallas import tpu as pltpu


# Double-buffered input VMEM budget used to size the spatial tile, and the
# explicit scoped-VMEM limit handed to Mosaic (fits v5e/v6e/v7x).
_INPUT_VMEM_BUDGET = 20 * 1024 * 1024
_VMEM_LIMIT_BYTES = 40 * 1024 * 1024


def _round_up(x, m):
    return -(-x // m) * m


def _sublane_pad_bytes(rows, itemsize):
    """VMEM bytes per lane for a block with `rows` sublanes of this dtype."""
    gran = 8 * max(1, 4 // itemsize)        # (8,128) native tile; <32-bit packs sublanes
    return _round_up(rows, gran) * itemsize


def _largest_divisor_leq(n, cap):
    cap = max(1, min(n, cap))
    for d in range(cap, 0, -1):
        if n % d == 0:
            return d
    return 1


def _dice_sums_kernel(pred_ref, true_ref, acc_ref, *, hw, needs_mask):
    """Accumulate per-class sums for one (batch-block, spatial-tile) step.

    pred_ref: (bn, C, T) input dtype — predictions
    true_ref: (bn, 1, T) integer     — class labels
    acc_ref : (bn, C, 3) float32     — resident accumulator:
              [..., 0] = sum(pred * onehot)
              [..., 1] = sum(pred)
              [..., 2] = sum(onehot)
    """
    i = pl.program_id(1)

    @pl.when(i == 0)
    def _():
        acc_ref[...] = jnp.zeros_like(acc_ref)

    pred = pred_ref[...].astype(jnp.float32)           # (bn, C, T) f32 accumulation
    labels = true_ref[...].astype(jnp.int32)           # (bn, 1, T) widen in-kernel
    _, c, t = pred.shape

    # one-hot(label == class_index) via broadcast of a tiny sublane iota.
    class_ids = jax.lax.broadcasted_iota(jnp.int32, (1, c, 1), 1)
    onehot = labels == class_ids                       # (bn, C, T) bool

    def _accumulate(pred_v, onehot_v):
        onehot_f = onehot_v.astype(jnp.float32)
        # Per-step accumulator traffic is amortized by the large tiles; keep
        # the simple masked sub-lane RMW stores.
        acc_ref[:, :, 0:1] += jnp.sum(jnp.where(onehot_v, pred_v, 0.0),
                                      axis=-1, keepdims=True)
        acc_ref[:, :, 1:2] += jnp.sum(pred_v, axis=-1, keepdims=True)
        acc_ref[:, :, 2:3] += jnp.sum(onehot_f, axis=-1, keepdims=True)

    if needs_mask:
        last = pl.num_programs(1) - 1

        @pl.when(i == last)            # ragged tail tile: mask padded lanes
        def _():
            lane = jax.lax.broadcasted_iota(jnp.int32, (1, 1, t), 2)
            valid = (i * t + lane) < hw
            _accumulate(jnp.where(valid, pred, 0.0),
                        jnp.logical_and(onehot, valid))

        @pl.when(i != last)            # interior tiles: no mask cost
        def _():
            _accumulate(pred, onehot)
    else:
        _accumulate(pred, onehot)


def _dice_sums(y_pred, y_true, *, max_lanes=None):
    """y_pred: (N, C, H, W) float; y_true: (N, H, W) int -> three (C,) f32 sums."""
    n, c, h, w = y_pred.shape
    hw = h * w

    # Free, layout-preserving reshapes (no host transpose / pad / upcast).
    pred = y_pred.reshape(n, c, hw)
    if not jnp.issubdtype(y_true.dtype, jnp.integer):
        y_true = y_true.astype(jnp.int32)
    labels = y_true.reshape(n, 1, hw)                  # native int dtype

    # Lanes per grid step from the VMEM budget (double-buffered, sublane-padded).
    per_lane = 2 * (_sublane_pad_bytes(c, jnp.dtype(pred.dtype).itemsize)
                    + _sublane_pad_bytes(1, jnp.dtype(labels.dtype).itemsize))
    budget_lanes = max(512, (_INPUT_VMEM_BUDGET // per_lane) // 128 * 128)
    if max_lanes is not None:                          # test/tuning override
        budget_lanes = max(128, min(budget_lanes, _round_up(max_lanes, 128)))

    if hw <= budget_lanes:
        # One spatial tile covers the image; block batch elements per step so
        # small-image workloads aren't per-step-overhead bound.
        tile, num_tiles, needs_mask = hw, 1, False
        per_batch_lanes = max(1, _round_up(hw, 128))
        bn = _largest_divisor_leq(n, budget_lanes // per_batch_lanes)
    else:
        tile = budget_lanes                            # multiple of 128
        num_tiles = pl.cdiv(hw, tile)
        needs_mask = (hw % tile) != 0
        bn = 1

    kernel = functools.partial(_dice_sums_kernel, hw=hw, needs_mask=needs_mask)

    out = pl.pallas_call(
        kernel,
        out_shape=jax.ShapeDtypeStruct((n, c, 3), jnp.float32),
        grid_spec=pltpu.PrefetchScalarGridSpec(
            num_scalar_prefetch=0,
            grid=(n // bn, num_tiles),
            in_specs=[
                pl.BlockSpec((bn, c, tile), lambda b, i: (b, 0, i)),
                pl.BlockSpec((bn, 1, tile), lambda b, i: (b, 0, i)),
            ],
            out_specs=pl.BlockSpec((bn, c, 3), lambda b, i: (b, 0, 0)),
        ),
        compiler_params=pltpu.CompilerParams(
            dimension_semantics=("parallel", "arbitrary"),
            vmem_limit_bytes=_VMEM_LIMIT_BYTES),
    )(pred, labels)

    sums = out.sum(axis=0)                             # tiny (C, 3) combine in JAX
    return sums[:, 0], sums[:, 1], sums[:, 2]


@functools.partial(jax.jit, static_argnames=("smooth", "max_lanes"))
def dice_loss(y_pred, y_true, weights, smooth=1e-6, max_lanes=None):
    """Semantics match DiceLoss.forward.

    y_pred : (N, C, H, W) float   (C = num_classes + 1)
    y_true : (N, H, W) integer class labels
    weights: (C,) float
    """
    intersect, pred_sum, true_sum = _dice_sums(y_pred, y_true, max_lanes=max_lanes)

    intersect = weights.astype(jnp.float32) * intersect
    denominator = pred_sum + true_sum
    # note operator precedence: (... / denominator) + smooth, as in PyTorch
    return 1.0 - jnp.mean(2.0 * (intersect + smooth) / denominator + smooth)


def _reference_loss(y_pred, y_true, weights, smooth=1e-6):
    c = y_pred.shape[1]
    onehot = jax.nn.one_hot(y_true, c, axis=1, dtype=jnp.float32)   # (N,C,H,W)
    pf = jnp.transpose(y_pred, (1, 0, 2, 3)).reshape(c, -1)
    tf = jnp.transpose(onehot, (1, 0, 2, 3)).reshape(c, -1)
    inter = weights * (pf * tf).sum(-1)
    den = pf.sum(-1) + tf.sum(-1)
    return 1.0 - jnp.mean(2.0 * (inter + smooth) / den + smooth)


if __name__ == "__main__":
    # num_classes = 3  ->  C = num_classes + 1 = 4 channels
    num_classes = 3
    C = num_classes + 1

    key = jax.random.PRNGKey(0)
    kp, kt = jax.random.split(key)
    weights = jnp.array([0.5, 1.0, 1.5, 2.0], dtype=jnp.float32)

    # --- case 1: small shape, single tile, batch-blocked (bn=2) -------------
    N, H, W = 2, 16, 16
    logits = jax.random.normal(kp, (N, C, H, W), dtype=jnp.float32)
    y_pred = jax.nn.softmax(logits, axis=1)
    y_true = jax.random.randint(kt, (N, H, W), 0, C, dtype=jnp.int32)

    loss = dice_loss(y_pred, y_true, weights)
    jax.block_until_ready(loss)
    ref = _reference_loss(y_pred, y_true, weights)
    assert jnp.allclose(loss, ref, atol=1e-5, rtol=1e-5), (loss, ref)

    # --- case 2: ragged spatial size, multi-tile + gated tail-mask path -----
    N2, H2, W2 = 2, 33, 33   # H*W = 1089 (not a multiple of the forced tile)
    logits2 = jax.random.normal(kp, (N2, C, H2, W2), dtype=jnp.float32)
    y_pred2 = jax.nn.softmax(logits2, axis=1)
    y_true2 = jax.random.randint(kt, (N2, H2, W2), 0, C, dtype=jnp.int32)

    loss2 = dice_loss(y_pred2, y_true2, weights, max_lanes=512)
    jax.block_until_ready(loss2)
    ref2 = _reference_loss(y_pred2, y_true2, weights)
    assert jnp.allclose(loss2, ref2, atol=1e-5, rtol=1e-5), (loss2, ref2)

    # --- case 3: odd batch, non-128-aligned full-dim tile, bn=3 --------------
    N3, H3, W3 = 3, 33, 33
    logits3 = jax.random.normal(kp, (N3, C, H3, W3), dtype=jnp.float32)
    y_pred3 = jax.nn.softmax(logits3, axis=1)
    y_true3 = jax.random.randint(kt, (N3, H3, W3), 0, C, dtype=jnp.int32)

    loss3 = dice_loss(y_pred3, y_true3, weights)
    jax.block_until_ready(loss3)
    ref3 = _reference_loss(y_pred3, y_true3, weights)
    assert jnp.allclose(loss3, ref3, atol=1e-5, rtol=1e-5), (loss3, ref3)

    print("KERNEL_OK")
</pallas_src>

<mosaic_0001>
module attributes {stable_mosaic.version = 11 : i64} {
  func.func @_dice_sums_kernel(%arg0: i32, %arg1: i32, %arg2: memref<2x4x256xf32, #tpu.memory_space<vmem>>, %arg3: memref<2x1x256xi32, #tpu.memory_space<vmem>>, %arg4: memref<2x4x3xf32, #tpu.memory_space<vmem>>) attributes {dimension_semantics = [#tpu.dimension_semantics<parallel>, #tpu.dimension_semantics<arbitrary>], iteration_bounds = array<i64: 1, 1>, scalar_prefetch = 0 : i64, scratch_operands = 0 : i64, tpu.core_type = #tpu.core_type<tc>, window_params = [{transform_indices = @transform_0, window_bounds = array<i64: 2, 4, 256>}, {transform_indices = @transform_1, window_bounds = array<i64: 2, 1, 256>}, {transform_indices = @transform_2, window_bounds = array<i64: 2, 4, 3>}]} {
    %c0_i32 = arith.constant 0 : i32
    %0 = arith.cmpi eq, %arg1, %c0_i32 : i32
    %1 = arith.extui %0 : i1 to i32
    %c0_i32_0 = arith.constant 0 : i32
    %2 = arith.cmpi ne, %1, %c0_i32_0 : i32
    scf.if %2 {
      %cst_25 = arith.constant 0.000000e+00 : f32
      %28 = vector.broadcast %cst_25 : f32 to vector<2x4x3xf32>
      %c0_26 = arith.constant 0 : index
      %c0_27 = arith.constant 0 : index
      %c0_28 = arith.constant 0 : index
      %29 = vector.load %arg4[%c0_26, %c0_27, %c0_28] : memref<2x4x3xf32, #tpu.memory_space<vmem>>, vector<2x4x3xf32>
      tpu.vector_store %arg4[%c0_26, %c0_27, %c0_28], %28 {strides = array<i32>} : memref<2x4x3xf32, #tpu.memory_space<vmem>>, vector<2x4x3xf32>,
    } else {
    }
    %c0 = arith.constant 0 : index
    %c0_1 = arith.constant 0 : index
    %c0_2 = arith.constant 0 : index
    %3 = vector.load %arg2[%c0, %c0_1, %c0_2] : memref<2x4x256xf32, #tpu.memory_space<vmem>>, vector<2x4x256xf32>
    %c0_3 = arith.constant 0 : index
    %c0_4 = arith.constant 0 : index
    %c0_5 = arith.constant 0 : index
    %4 = vector.load %arg3[%c0_3, %c0_4, %c0_5] : memref<2x1x256xi32, #tpu.memory_space<vmem>>, vector<2x1x256xi32>
    %5 = tpu.iota {dimensions = array<i32: 1>} : vector<1x4x1xi32>
    %6 = vector.broadcast %4 : vector<2x1x256xi32> to vector<2x4x256xi32>
    %7 = vector.broadcast %5 : vector<1x4x1xi32> to vector<2x4x256xi32>
    %8 = arith.cmpi eq, %6, %7 : vector<2x4x256xi32>
    %9 = arith.extui %8 : vector<2x4x256xi1> to vector<2x4x256xi32>
    %10 = arith.sitofp %9 : vector<2x4x256xi32> to vector<2x4x256xf32>
    %c0_6 = arith.constant 0 : index
    %c0_7 = arith.constant 0 : index
    %c0_8 = arith.constant 0 : index
    %11 = vector.load %arg4[%c0_6, %c0_7, %c0_8] : memref<2x4x3xf32, #tpu.memory_space<vmem>>, vector<2x4x1xf32>
    %cst = arith.constant 0.000000e+00 : f32
    %12 = vector.broadcast %cst : f32 to vector<2x4x256xf32>
    %13 = arith.select %8, %3, %12 : vector<2x4x256xi1>, vector<2x4x256xf32>
    %cst_9 = arith.constant dense<0.000000e+00> : vector<2x4xf32>
    %14 = vector.multi_reduction <add>, %13, %cst_9 [2] : vector<2x4x256xf32> to vector<2x4xf32>
    %15 = vector.shape_cast %14 : vector<2x4xf32> to vector<2x4x1xf32>
    %16 = arith.addf %11, %15 : vector<2x4x1xf32>
    %c0_10 = arith.constant 0 : index
    %c0_11 = arith.constant 0 : index
    %c0_12 = arith.constant 0 : index
    %17 = vector.load %arg4[%c0_10, %c0_11, %c0_12] : memref<2x4x3xf32, #tpu.memory_space<vmem>>, vector<2x4x1xf32>
    tpu.vector_store %arg4[%c0_10, %c0_11, %c0_12], %16 {strides = array<i32>} : memref<2x4x3xf32, #tpu.memory_space<vmem>>, vector<2x4x1xf32>,
    %c0_13 = arith.constant 0 : index
    %c0_14 = arith.constant 0 : index
    %c1 = arith.constant 1 : index
    %18 = vector.load %arg4[%c0_13, %c0_14, %c1] : memref<2x4x3xf32, #tpu.memory_space<vmem>>, vector<2x4x1xf32>
    %cst_15 = arith.constant dense<0.000000e+00> : vector<2x4xf32>
    %19 = vector.multi_reduction <add>, %3, %cst_15 [2] : vector<2x4x256xf32> to vector<2x4xf32>
    %20 = vector.shape_cast %19 : vector<2x4xf32> to vector<2x4x1xf32>
    %21 = arith.addf %18, %20 : vector<2x4x1xf32>
    %c0_16 = arith.constant 0 : index
    %c0_17 = arith.constant 0 : index
    %c1_18 = arith.constant 1 : index
    %22 = vector.load %arg4[%c0_16, %c0_17, %c1_18] : memref<2x4x3xf32, #tpu.memory_space<vmem>>, vector<2x4x1xf32>
    tpu.vector_store %arg4[%c0_16, %c0_17, %c1_18], %21 {strides = array<i32>} : memref<2x4x3xf32, #tpu.memory_space<vmem>>, vector<2x4x1xf32>,
    %c0_19 = arith.constant 0 : index
    %c0_20 = arith.constant 0 : index
    %c2 = arith.constant 2 : index
    %23 = vector.load %arg4[%c0_19, %c0_20, %c2] : memref<2x4x3xf32, #tpu.memory_space<vmem>>, vector<2x4x1xf32>
    %cst_21 = arith.constant dense<0.000000e+00> : vector<2x4xf32>
    %24 = vector.multi_reduction <add>, %10, %cst_21 [2] : vector<2x4x256xf32> to vector<2x4xf32>
    %25 = vector.shape_cast %24 : vector<2x4xf32> to vector<2x4x1xf32>
    %26 = arith.addf %23, %25 : vector<2x4x1xf32>
    %c0_22 = arith.constant 0 : index
    %c0_23 = arith.constant 0 : index
    %c2_24 = arith.constant 2 : index
    %27 = vector.load %arg4[%c0_22, %c0_23, %c2_24] : memref<2x4x3xf32, #tpu.memory_space<vmem>>, vector<2x4x1xf32>
    tpu.vector_store %arg4[%c0_22, %c0_23, %c2_24], %26 {strides = array<i32>} : memref<2x4x3xf32, #tpu.memory_space<vmem>>, vector<2x4x1xf32>,
    return
  }
  func.func @transform_0(%arg0: i32, %arg1: i32) -> (i32, i32, i32) {
    %c0_i32 = arith.constant 0 : i32
    %c0_i32_0 = arith.constant 0 : i32
    return %arg0, %c0_i32, %arg1 : i32, i32, i32
  }
  func.func @transform_1(%arg0: i32, %arg1: i32) -> (i32, i32, i32) {
    %c0_i32 = arith.constant 0 : i32
    %c0_i32_0 = arith.constant 0 : i32
    return %arg0, %c0_i32, %arg1 : i32, i32, i32
  }
  func.func @transform_2(%arg0: i32, %arg1: i32) -> (i32, i32, i32) {
    %c0_i32 = arith.constant 0 : i32
    %c0_i32_0 = arith.constant 0 : i32
    %c0_i32_1 = arith.constant 0 : i32
    return %arg0, %c0_i32, %c0_i32_0 : i32, i32, i32
  }
}

</mosaic_0001>

<bundles_post_ra>
// kernel: dice_loss.1
= control target key start
LH: loop header
LB: loop body
LE: loop exit
PB: predicated region body
PF: predicated region fallthrough
CT: control target
= control target key end

     0   :  { %v22_v0 = vlaneseq  ;;  %vm15_vm0 = vcmask 19456   ;;  %vm64_vm1 = vcmask 1043456   ;;  %v125_v3 = vmov 0.0   ;;  %s207_s0 = inlined_call_operand.vmem [shape: f32[2,4,256], index: 0, kind: input, shape index: {}]   ;;  %s208_s1 = inlined_call_operand.vmem [shape: s32[2,1,256], index: 1, kind: input, shape index: {}]   ;;  %s209_s2 = inlined_call_operand.vmem [shape: f32[2,4,3], index: 2, kind: output, shape index: {}]  }
   0x1   :  { %v18_v1 = vld [vmem:[%s207_s0] sm:$0xff]  ;;  %v19_v2 = vld [vmem:[%s207_s0 + $0x8] sm:$0xff]  ;;  %16 = vst.msk [vmem:[%s209_s2] sm:$0xf] %vm15_vm0, %v125_v3  ;;  %17 = vst.msk [vmem:[%s209_s2 + $0x4] sm:$0xf] %vm15_vm0, %v125_v3 }
   0x2   :  { %v23_v4 = vshrl.u32 %v22_v0, 7  ;;  %v56_v5 = vcombine.high %v18_v1, %v18_v1  ;;  %v57_v6 = vcombine.high %v19_v2, %v19_v2  ;;  %v82_v7 = vsel %vm64_vm1, %v18_v1, 0.0  ;;  %v20_v8 = vld [vmem:[%s208_s1] sm:$0x3]  ;;  %v21_v9 = vld [vmem:[%s208_s1 + $0x2] sm:$0x3] }
   0x3   :  { %v87_v10 = vsel %vm64_vm1, %v19_v2, 0.0  ;;  %vm77_vm6 = vcmask 3072   ;;  %vm94_vm7 = vcmask 11272   ;;  %vm111_vm8 = vcmask 19472  }
   0x4   :  { %v26_v11 = vsub.s32 0, %v23_v4  ;;  %v30_v12 = vsub.s32 1, %v23_v4  ;;  %v83_v13 = vsel %vm64_vm1, %v56_v5, 0.0  ;;  %v88_v14 = vsel %vm64_vm1, %v57_v6, 0.0 }
   0x5   :  { %v84_v15 = vadd.f32 %v83_v13, %v82_v7  ;;  %v89_v20 = vadd.f32 %v88_v14, %v87_v10 }
   0x6   :  { %v27_v16 = vrot.slane %v20_v8, %v26_v11  ;;  %v31_v17 = vrot.slane %v20_v8, %v30_v12  ;;  %v35_v18 = vrot.slane %v21_v9, %v26_v11  ;;  %v39_v19 = vrot.slane %v21_v9, %v30_v12 }
   0x7   :  { %85 = vadd.xlane.f32.xlu1 %v84_v15 }
   0x8   :  { %vm40_vm2 = vcmp.eq.s32.totalorder %v27_v16, %v23_v4  ;;  %vm41_vm3 = vcmp.eq.s32.totalorder %v31_v17, %v23_v4  ;;  %vm42_vm4 = vcmp.eq.s32.totalorder %v35_v18, %v23_v4  ;;  %vm43_vm5 = vcmp.eq.s32.totalorder %v39_v19, %v23_v4  ;;  %v52_v41 = vld [vmem:[%s209_s2] sm:$0xf]  ;;  %v53_v44 = vld [vmem:[%s209_s2 + $0x4] sm:$0xf] }
   0x9   :  { %v60_v21 = vsel %vm40_vm2, %v18_v1, 0.0  ;;  %v61_v22 = vsel %vm41_vm3, %v56_v5, 0.0  ;;  %v62_v23 = vsel %vm42_vm4, %v19_v2, 0.0  ;;  %v63_v24 = vsel %vm43_vm5, %v57_v6, 0.0 }
   0xa   :  { %v65_v25 = vsel %vm64_vm1, %v60_v21, 0.0  ;;  %v66_v26 = vsel %vm64_vm1, %v61_v22, 0.0  ;;  %v70_v27 = vsel %vm64_vm1, %v62_v23, 0.0  ;;  %v71_v28 = vsel %vm64_vm1, %v63_v24, 0.0 }
   0xb   :  { %v67_v29 = vadd.f32 %v66_v26, %v65_v25  ;;  %90 = vadd.xlane.f32.xlu1 %v89_v20  ;;  %v118_v30 = vsel %vm40_vm2, 1.0, %v125_v3  ;;  %v119_v31 = vsel %vm41_vm3, 1.0, %v125_v3  ;;  %v120_v32 = vsel %vm42_vm4, 1.0, %v125_v3 }
   0xc   :  { %v121_v33 = vsel %vm43_vm5, 1.0, %v125_v3  ;;  %v72_v34 = vadd.f32 %v71_v28, %v70_v27  ;;  %v104_v35 = vsel %vm64_vm1, %v120_v32, 0.0  ;;  %v99_v37 = vsel %vm64_vm1, %v118_v30, 0.0 }
   0xd   :  { %68 = vadd.xlane.f32.xlu0 %v67_v29  ;;  %v105_v36 = vsel %vm64_vm1, %v121_v33, 0.0  ;;  %v100_v38 = vsel %vm64_vm1, %v119_v31, 0.0 }
   0xe   :  { %v106_v39 = vadd.f32 %v105_v36, %v104_v35  ;;  %v101_v40 = vadd.f32 %v100_v38, %v99_v37 }
  0x10   :  { %107 = vadd.xlane.f32.xlu1 %v106_v39 }
  0x11   :  { %73 = vadd.xlane.f32.xlu0 %v72_v34 }
  0x15   :  { %102 = vadd.xlane.f32.xlu0 %v101_v40 }
  0x94   :  { %v86_v47 = vpop.xlane.xlu1 %85 }
  0x98   :  { %v91_v50 = vpop.xlane.xlu1 %90 }
  0x9a   :  { %v69_v42 = vpop.xlane.xlu0 %68 }
  0x9b   :  { %v75_v43 = vadd.f32 %v69_v42, %v52_v41 }
  0x9d   :  { %78 = vst.msk [vmem:[%s209_s2] sm:$0xf] %vm77_vm6, %v75_v43  ;;  %v108_v56 = vpop.xlane.xlu1 %107 }
  0x9e   :  { %v74_v45 = vpop.xlane.xlu0 %73 }
  0x9f   :  { %v76_v46 = vadd.f32 %v74_v45, %v53_v44 }
  0xa1   :  { %79 = vst.msk [vmem:[%s209_s2 + $0x4] sm:$0xf] %vm77_vm6, %v76_v46 }
  0xa2   :  { %v103_v53 = vpop.xlane.xlu0 %102 }
  0xa4   :  { %v80_v48 = vld [vmem:[%s209_s2] sm:$0xf] }
  0xa5   :  { %v92_v49 = vadd.f32 %v86_v47, %v80_v48 }
  0xa7   :  { %95 = vst.msk [vmem:[%s209_s2] sm:$0xf] %vm94_vm7, %v92_v49 }
  0xa8   :  { %v81_v51 = vld [vmem:[%s209_s2 + $0x4] sm:$0xf] }
  0xa9   :  { %v93_v52 = vadd.f32 %v91_v50, %v81_v51 }
  0xab   :  { %96 = vst.msk [vmem:[%s209_s2 + $0x4] sm:$0xf] %vm94_vm7, %v93_v52 }
  0xae   :  { %v97_v54 = vld [vmem:[%s209_s2] sm:$0xf] }
  0xaf   :  { %v109_v55 = vadd.f32 %v103_v53, %v97_v54 }
  0xb1   :  { %112 = vst.msk [vmem:[%s209_s2] sm:$0xf] %vm111_vm8, %v109_v55 }
  0xb2   :  { %v98_v57 = vld [vmem:[%s209_s2 + $0x4] sm:$0xf] }
  0xb3   :  { %v110_v58 = vadd.f32 %v108_v56, %v98_v57 }
  0xb5   :  { %113 = vst.msk [vmem:[%s209_s2 + $0x4] sm:$0xf] %vm111_vm8, %v110_v58 }

</bundles_post_ra>
